<compile_context>
chip_gen: v6e
topology: v6e:2x2x1
jax: 0.10.0
libtpu: 0.0.40
codegen_flags: <defaults>
</compile_context>

<pallas_src>
import functools

import jax
import jax.numpy as jnp
from jax.experimental import pallas as pl
from jax.experimental.pallas import tpu as pltpu

HIDDEN_UNITS = 100   # logical hidden width (matches the PyTorch module)
H_PAD = 128          # lane-aligned hidden width used inside the kernel
_LANE = 128
_TM_MAX = 4096       # max rows (lanes) per grid step


def _cdiv(a, b):
    return -(-a // b)


def _round_up(a, b):
    return _cdiv(a, b) * b


def _supports_bf16_eup():
    """bf16 EUP/VPU exists on v6e/v7x; v5e and older do not."""
    try:
        kind = jax.devices()[0].device_kind.lower()
    except Exception:
        return False
    return ("v6" in kind) or ("v7" in kind)


def _mlp_kernel_t(x_ref, w1_ref, b1_ref, w2_ref, b2_ref, w3_ref, b3_ref, o_ref,
                  *, bf16_tanh):
    # Transposed (feature-major) layout: M is the lane (last) dimension.
    # x_ref : (2, TM)        f32
    # w1    : (H_PAD, 2)     f32    b1: (H_PAD, 1) f32
    # w2    : (H_PAD, H_PAD) bf16   b2: (H_PAD, 1) f32   (already transposed)
    # w3    : (2, H_PAD)     bf16   b3: (2, 1)     f32   (already transposed)
    # o_ref : (2, TM)        f32
    x = x_ref[...]
    w1 = w1_ref[...]

    # Layer 1: K=2 contraction -> VPU outer-product FMA (don't waste the MXU).
    z1 = w1[:, 0:1] * x[0:1, :] + w1[:, 1:2] * x[1:2, :] + b1_ref[...]
    if bf16_tanh:
        h1 = jnp.tanh(z1.astype(jnp.bfloat16))            # bf16 EUP (v6e/v7x)
    else:
        h1 = jnp.tanh(z1).astype(jnp.bfloat16)            # f32 EUP (v5e-safe)

    # Layer 2: (128,128) @ (128,TM) on the MXU, bf16 operands, f32 accumulate.
    z2 = jnp.dot(w2_ref[...], h1,
                 preferred_element_type=jnp.float32) + b2_ref[...]
    if bf16_tanh:
        h2 = jnp.tanh(z2.astype(jnp.bfloat16))
    else:
        h2 = jnp.tanh(z2).astype(jnp.bfloat16)

    # Layer 3: (2,128) @ (128,TM), bf16 operands, f32 accumulate.
    out = jnp.dot(w3_ref[...], h2,
                  preferred_element_type=jnp.float32) + b3_ref[...]
    o_ref[...] = out.astype(o_ref.dtype)


def _choose_tiling(m):
    """Lane-aligned M tiling.

    Tiny problems run as a single 128-wide block; otherwise we use >= 2
    balanced tiles (so v7x can use both TensorCores) sized as the smallest
    multiple of 128 that keeps the tile count, capping TM at _TM_MAX.
    """
    if m <= 256:
        return max(_LANE, _round_up(m, _LANE)), 1
    num_tiles = max(2, _cdiv(m, _TM_MAX))
    tm = _round_up(_cdiv(m, num_tiles), _LANE)
    num_tiles = _cdiv(m, tm)
    return tm, num_tiles


def mlp_forward_t(x_t, kparams, bf16_tanh=None):
    """x_t: (2, M) float32 -> (2, M) float32 via a tiled pallas_call."""
    w1t, b1t, w2t, b2t, w3t, b3t = kparams
    if bf16_tanh is None:
        bf16_tanh = _supports_bf16_eup()

    M = x_t.shape[1]
    TM, num_tiles = _choose_tiling(M)
    M_pad = num_tiles * TM
    if M_pad != M:
        x_t = jnp.pad(x_t, ((0, 0), (0, M_pad - M)))

    const = lambda shape: pl.BlockSpec(shape, lambda i: (0, 0))
    kernel = functools.partial(_mlp_kernel_t, bf16_tanh=bf16_tanh)

    out = pl.pallas_call(
        kernel,
        out_shape=jax.ShapeDtypeStruct((2, M_pad), jnp.float32),
        grid=(num_tiles,),
        in_specs=[
            pl.BlockSpec((2, TM), lambda i: (0, i)),   # x^T: tiled over M (lanes)
            const((H_PAD, 2)),                          # w1^T (resident)
            const((H_PAD, 1)),                          # b1
            const((H_PAD, H_PAD)),                      # w2^T
            const((H_PAD, 1)),                          # b2
            const((2, H_PAD)),                          # w3^T
            const((2, 1)),                              # b3
        ],
        out_specs=pl.BlockSpec((2, TM), lambda i: (0, i)),
        compiler_params=pltpu.CompilerParams(
            dimension_semantics=("parallel",),   # shard M across TCs on v7x
            vmem_limit_bytes=32 << 20,
        ),
    )(x_t, w1t, b1t, w2t, b2t, w3t, b3t)

    return out[:, :M] if M_pad != M else out


def neural_network_forward(x, y, kparams, bf16_tanh=None):
    """Matches NeuralNetwork.forward: x, y are (B, N, 1); returns (B, N, 2)."""
    B, N, _ = x.shape
    # Build the feature-major (2, B*N) input directly (instead of concat) so
    # the kernel sees a lane-dense M axis.
    flat_t = jnp.stack((x.reshape(B * N), y.reshape(B * N)), axis=0)
    out_t = mlp_forward_t(flat_t.astype(jnp.float32), kparams, bf16_tanh)
    return out_t.T.reshape(B, N, 2)


def init_params(key, hidden=HIDDEN_UNITS):
    """Xavier-uniform weights, biases filled with 0.01 (mirrors init_weights)."""
    def xavier(k, fan_in, fan_out):
        limit = jnp.sqrt(6.0 / (fan_in + fan_out))
        return jax.random.uniform(k, (fan_in, fan_out), jnp.float32, -limit, limit)

    k1, k2, k3 = jax.random.split(key, 3)
    w1 = xavier(k1, 2, hidden)
    b1 = jnp.full((1, hidden), 0.01, jnp.float32)
    w2 = xavier(k2, hidden, hidden)
    b2 = jnp.full((1, hidden), 0.01, jnp.float32)
    w3 = xavier(k3, hidden, 2)
    b3 = jnp.full((1, 2), 0.01, jnp.float32)
    return (w1, b1, w2, b2, w3, b3)


def prepare_kernel_params(params, h_pad=H_PAD):
    """One-time pad (H -> 128), transpose, and bf16-cast of the MXU operands.

    Zero-padded biases and zero-padded w3 rows keep the padded lanes at
    tanh(0)=0, so the padded network is numerically identical to the H=100
    network (up to bf16 rounding of the matmul operands).
    """
    w1, b1, w2, b2, w3, b3 = params
    h = w1.shape[1]
    pw = h_pad - h
    w1t = jnp.pad(w1, ((0, 0), (0, pw))).T.astype(jnp.float32)     # (H_PAD, 2)
    b1t = jnp.pad(b1, ((0, 0), (0, pw))).reshape(h_pad, 1).astype(jnp.float32)
    w2t = jnp.pad(w2, ((0, pw), (0, pw))).T.astype(jnp.bfloat16)   # (H_PAD, H_PAD)
    b2t = jnp.pad(b2, ((0, 0), (0, pw))).reshape(h_pad, 1).astype(jnp.float32)
    w3t = jnp.pad(w3, ((0, pw), (0, 0))).T.astype(jnp.bfloat16)    # (2, H_PAD)
    b3t = b3.reshape(2, 1).astype(jnp.float32)
    return (w1t, b1t, w2t, b2t, w3t, b3t)


if __name__ == "__main__":
    key = jax.random.PRNGKey(0)
    kp, kx, ky = jax.random.split(key, 3)

    params = init_params(kp)
    kparams = prepare_kernel_params(params)     # padded/transposed/bf16 once
    use_bf16_tanh = _supports_bf16_eup()

    # Small shapes consistent with the module's forward: x, y are (B, N, 1).
    B, N = 2, 8
    x = jax.random.normal(kx, (B, N, 1), jnp.float32)
    y = jax.random.normal(ky, (B, N, 1), jnp.float32)

    out = neural_network_forward(x, y, kparams, bf16_tanh=use_bf16_tanh)
    out = jax.block_until_ready(out)
    assert out.shape == (B, N, 2)

    # --- Check 1 (tight): pure-JAX reference doing the same transposed /
    # padded / bf16 math (including the same tanh precision choice).
    w1t, b1t, w2t, b2t, w3t, b3t = kparams
    xc_t = jnp.stack((x.reshape(B * N), y.reshape(B * N)), axis=0)  # (2, M)
    z1 = w1t[:, 0:1] * xc_t[0:1, :] + w1t[:, 1:2] * xc_t[1:2, :] + b1t
    h1 = jnp.tanh(z1.astype(jnp.bfloat16)) if use_bf16_tanh else jnp.tanh(z1).astype(jnp.bfloat16)
    z2 = jnp.dot(w2t, h1, preferred_element_type=jnp.float32) + b2t
    h2 = jnp.tanh(z2.astype(jnp.bfloat16)) if use_bf16_tanh else jnp.tanh(z2).astype(jnp.bfloat16)
    ref_bf16 = (jnp.dot(w3t, h2, preferred_element_type=jnp.float32) + b3t).T.reshape(B, N, 2)
    assert jnp.allclose(out, ref_bf16, atol=1e-4, rtol=1e-4)

    # --- Check 2 (loose): full-f32 reference matching the PyTorch module; the
    # only deviation is bf16 rounding of the MXU operands / tanh (~1e-2 level).
    w1, b1, w2, b2, w3, b3 = params
    xc = jnp.concatenate((x, y), axis=2).reshape(B * N, 2)
    rf = jnp.tanh(xc @ w1 + b1)
    rf = jnp.tanh(rf @ w2 + b2)
    ref_f32 = (rf @ w3 + b3).reshape(B, N, 2)
    assert jnp.allclose(out, ref_f32, atol=5e-2, rtol=5e-2)

    print("KERNEL_OK")
</pallas_src>

<mosaic_0001>
module attributes {stable_mosaic.version = 11 : i64} {
  func.func @_mlp_kernel_t(%arg0: i32, %arg1: memref<2x128xf32, #tpu.memory_space<vmem>>, %arg2: memref<128x2xf32, #tpu.memory_space<vmem>>, %arg3: memref<128x1xf32, #tpu.memory_space<vmem>>, %arg4: memref<128x128xbf16, #tpu.memory_space<vmem>>, %arg5: memref<128x1xf32, #tpu.memory_space<vmem>>, %arg6: memref<2x128xbf16, #tpu.memory_space<vmem>>, %arg7: memref<2x1xf32, #tpu.memory_space<vmem>>, %arg8: memref<2x128xf32, #tpu.memory_space<vmem>>) attributes {dimension_semantics = [#tpu.dimension_semantics<parallel>], iteration_bounds = array<i64: 1>, scalar_prefetch = 0 : i64, scratch_operands = 0 : i64, tpu.core_type = #tpu.core_type<tc>, window_params = [{transform_indices = @transform_0, window_bounds = array<i64: 2, 128>}, {pipeline_mode = #tpu.pipeline_mode<synchronous>, transform_indices = @transform_1, window_bounds = array<i64: 128, 2>}, {pipeline_mode = #tpu.pipeline_mode<synchronous>, transform_indices = @transform_2, window_bounds = array<i64: 128, 1>}, {pipeline_mode = #tpu.pipeline_mode<synchronous>, transform_indices = @transform_3, window_bounds = array<i64: 128, 128>}, {pipeline_mode = #tpu.pipeline_mode<synchronous>, transform_indices = @transform_4, window_bounds = array<i64: 128, 1>}, {pipeline_mode = #tpu.pipeline_mode<synchronous>, transform_indices = @transform_5, window_bounds = array<i64: 2, 128>}, {pipeline_mode = #tpu.pipeline_mode<synchronous>, transform_indices = @transform_6, window_bounds = array<i64: 2, 1>}, {transform_indices = @transform_7, window_bounds = array<i64: 2, 128>}]} {
    %c0 = arith.constant 0 : index
    %c0_0 = arith.constant 0 : index
    %0 = vector.load %arg1[%c0, %c0_0] : memref<2x128xf32, #tpu.memory_space<vmem>>, vector<2x128xf32>
    %c0_1 = arith.constant 0 : index
    %c0_2 = arith.constant 0 : index
    %1 = vector.load %arg2[%c0_1, %c0_2] : memref<128x2xf32, #tpu.memory_space<vmem>>, vector<128x2xf32>
    %2 = vector.extract_strided_slice %1 {offsets = [0, 0], sizes = [128, 1], strides = [1, 1]} : vector<128x2xf32> to vector<128x1xf32>
    %3 = vector.extract_strided_slice %0 {offsets = [0, 0], sizes = [1, 128], strides = [1, 1]} : vector<2x128xf32> to vector<1x128xf32>
    %4 = vector.broadcast %2 : vector<128x1xf32> to vector<128x128xf32>
    %5 = vector.broadcast %3 : vector<1x128xf32> to vector<128x128xf32>
    %6 = arith.mulf %4, %5 : vector<128x128xf32>
    %7 = vector.extract_strided_slice %1 {offsets = [0, 1], sizes = [128, 1], strides = [1, 1]} : vector<128x2xf32> to vector<128x1xf32>
    %8 = vector.extract_strided_slice %0 {offsets = [1, 0], sizes = [1, 128], strides = [1, 1]} : vector<2x128xf32> to vector<1x128xf32>
    %9 = vector.broadcast %7 : vector<128x1xf32> to vector<128x128xf32>
    %10 = vector.broadcast %8 : vector<1x128xf32> to vector<128x128xf32>
    %11 = arith.mulf %9, %10 : vector<128x128xf32>
    %12 = arith.addf %6, %11 : vector<128x128xf32>
    %c0_3 = arith.constant 0 : index
    %c0_4 = arith.constant 0 : index
    %13 = vector.load %arg3[%c0_3, %c0_4] : memref<128x1xf32, #tpu.memory_space<vmem>>, vector<128x1xf32>
    %14 = vector.broadcast %13 : vector<128x1xf32> to vector<128x128xf32>
    %15 = arith.addf %12, %14 : vector<128x128xf32>
    %16 = math.tanh %15 : vector<128x128xf32>
    %17 = arith.truncf %16 : vector<128x128xf32> to vector<128x128xbf16>
    %c0_5 = arith.constant 0 : index
    %c0_6 = arith.constant 0 : index
    %18 = vector.load %arg4[%c0_5, %c0_6] : memref<128x128xbf16, #tpu.memory_space<vmem>>, vector<128x128xbf16>
    %cst = arith.constant dense<0.000000e+00> : vector<128x128xf32>
    %19 = tpu.matmul %18, %17, %cst {dimension_numbers = #tpu.dot_dimension_numbers<[1], [0], [0], [1], [0, 0, 1, 1], [], []>} : vector<128x128xbf16>, vector<128x128xbf16>, vector<128x128xf32> -> vector<128x128xf32>
    %c0_7 = arith.constant 0 : index
    %c0_8 = arith.constant 0 : index
    %20 = vector.load %arg5[%c0_7, %c0_8] : memref<128x1xf32, #tpu.memory_space<vmem>>, vector<128x1xf32>
    %21 = vector.broadcast %20 : vector<128x1xf32> to vector<128x128xf32>
    %22 = arith.addf %19, %21 : vector<128x128xf32>
    %23 = math.tanh %22 : vector<128x128xf32>
    %24 = arith.truncf %23 : vector<128x128xf32> to vector<128x128xbf16>
    %c0_9 = arith.constant 0 : index
    %c0_10 = arith.constant 0 : index
    %25 = vector.load %arg6[%c0_9, %c0_10] : memref<2x128xbf16, #tpu.memory_space<vmem>>, vector<2x128xbf16>
    %cst_11 = arith.constant dense<0.000000e+00> : vector<2x128xf32>
    %26 = tpu.matmul %25, %24, %cst_11 {dimension_numbers = #tpu.dot_dimension_numbers<[1], [0], [0], [1], [0, 0, 1, 1], [], []>} : vector<2x128xbf16>, vector<128x128xbf16>, vector<2x128xf32> -> vector<2x128xf32>
    %c0_12 = arith.constant 0 : index
    %c0_13 = arith.constant 0 : index
    %27 = vector.load %arg7[%c0_12, %c0_13] : memref<2x1xf32, #tpu.memory_space<vmem>>, vector<2x1xf32>
    %28 = vector.broadcast %27 : vector<2x1xf32> to vector<2x128xf32>
    %29 = arith.addf %26, %28 : vector<2x128xf32>
    %c0_14 = arith.constant 0 : index
    %c0_15 = arith.constant 0 : index
    %30 = vector.load %arg8[%c0_14, %c0_15] : memref<2x128xf32, #tpu.memory_space<vmem>>, vector<2x128xf32>
    tpu.vector_store %arg8[%c0_14, %c0_15], %29 {strides = array<i32>} : memref<2x128xf32, #tpu.memory_space<vmem>>, vector<2x128xf32>,
    return
  }
  func.func @transform_0(%arg0: i32) -> (i32, i32) {
    %c0_i32 = arith.constant 0 : i32
    %c0_i32_0 = arith.constant 0 : i32
    return %c0_i32, %arg0 : i32, i32
  }
  func.func @transform_1(%arg0: i32) -> (i32, i32) {
    %c0_i32 = arith.constant 0 : i32
    %c0_i32_0 = arith.constant 0 : i32
    %c0_i32_1 = arith.constant 0 : i32
    return %c0_i32, %c0_i32_0 : i32, i32
  }
  func.func @transform_2(%arg0: i32) -> (i32, i32) {
    %c0_i32 = arith.constant 0 : i32
    %c0_i32_0 = arith.constant 0 : i32
    %c0_i32_1 = arith.constant 0 : i32
    return %c0_i32, %c0_i32_0 : i32, i32
  }
  func.func @transform_3(%arg0: i32) -> (i32, i32) {
    %c0_i32 = arith.constant 0 : i32
    %c0_i32_0 = arith.constant 0 : i32
    %c0_i32_1 = arith.constant 0 : i32
    return %c0_i32, %c0_i32_0 : i32, i32
  }
  func.func @transform_4(%arg0: i32) -> (i32, i32) {
    %c0_i32 = arith.constant 0 : i32
    %c0_i32_0 = arith.constant 0 : i32
    %c0_i32_1 = arith.constant 0 : i32
    return %c0_i32, %c0_i32_0 : i32, i32
  }
  func.func @transform_5(%arg0: i32) -> (i32, i32) {
    %c0_i32 = arith.constant 0 : i32
    %c0_i32_0 = arith.constant 0 : i32
    %c0_i32_1 = arith.constant 0 : i32
    return %c0_i32, %c0_i32_0 : i32, i32
  }
  func.func @transform_6(%arg0: i32) -> (i32, i32) {
    %c0_i32 = arith.constant 0 : i32
    %c0_i32_0 = arith.constant 0 : i32
    %c0_i32_1 = arith.constant 0 : i32
    return %c0_i32, %c0_i32_0 : i32, i32
  }
  func.func @transform_7(%arg0: i32) -> (i32, i32) {
    %c0_i32 = arith.constant 0 : i32
    %c0_i32_0 = arith.constant 0 : i32
    return %c0_i32, %arg0 : i32, i32
  }
}

</mosaic_0001>

<bundles_post_ra>
// kernel: tpu_custom_call.1
= control target key start
LH: loop header
LB: loop body
LE: loop exit
PB: predicated region body
PF: predicated region fallthrough
CT: control target
= control target key end

     0   :  { %v926_v2 = vmov 1   ;;  %v927_v7 = vmov 0   ;;  %s1249_s0 = inlined_call_operand.vmem [shape: f32[2,128], index: 0, kind: input, shape index: {}]   ;;  %s1250_s1 = inlined_call_operand.vmem [shape: f32[128,2], index: 1, kind: input, shape index: {}]   ;;  %s1251_s2 = inlined_call_operand.vmem [shape: f32[128,1], index: 2, kind: input, shape index: {}]   ;;  %s1252_s3 = inlined_call_operand.vmem [shape: bf16[128,128], index: 3, kind: input, shape index: {}]   ;;  %s1253_s4 = inlined_call_operand.vmem [shape: f32[128,1], index: 4, kind: input, shape index: {}]   ;;  %s1254_s5 = inlined_call_operand.vmem [shape: bf16[2,128], index: 5, kind: input, shape index: {}]   ;;  %s1255_s6 = inlined_call_operand.vmem [shape: f32[2,1], index: 6, kind: input, shape index: {}]   ;;  %s1256_s7 = inlined_call_operand.hbm [shape: f32[2,128], index: 7, kind: output, shape index: {}]  }
   0x1   :  { %v43_v0 = vld [vmem:[%s1250_s1 + $0x70] sm:$0xff]  ;;  %v41_v1 = vld [vmem:[%s1250_s1 + $0x60] sm:$0xff]  ;;  %816 = vset.pattern.permute.xlu0 %v926_v2  ;;  %814 = vset.pattern.permute.xlu1 %v926_v2  ;;  %v44_v3 = vld [vmem:[%s1250_s1 + $0x78] sm:$0xff] }
   0x2   :  { %202 = vperm.xlu1 %814, %v43_v0   ;;  %194 = vperm.xlu0 %816, %v41_v1   ;;  %v39_v4 = vld [vmem:[%s1250_s1 + $0x50] sm:$0xff]  ;;  %v37_v5 = vld [vmem:[%s1250_s1 + $0x40] sm:$0xff]  ;;  %v42_v6 = vld [vmem:[%s1250_s1 + $0x68] sm:$0xff] }
   0x3   :  { %v35_v8 = vld [vmem:[%s1250_s1 + $0x30] sm:$0xff]  ;;  %v33_v9 = vld [vmem:[%s1250_s1 + $0x20] sm:$0xff] }
   0x4   :  { %v259_v10 = vld [vmem:[%s1251_s2 + $0x70] sm:$0xff] }
   0x5   :  { %v1005_v11 = vld [vmem:[%s1250_s1 + $0x10] sm:$0xff] }
   0x6   :  { %206 = vperm.xlu1 %814, %v44_v3   ;;  %186 = vperm.xlu0 %816, %v39_v4  }
   0xa   :  { %815 = vset.pattern.permute.xlu1 %v927_v7  ;;  %178 = vperm.xlu0 %816, %v37_v5  }
   0xb   :  { %112 = vperm.xlu1 %815, %v42_v6  }
   0xe   :  { %170 = vperm.xlu0 %816, %v35_v8  }
   0xf   :  { %817 = vset.pattern.permute.xlu1 %v926_v2 }
  0x10   :  { %198 = vperm.xlu1 %817, %v42_v6  }
  0x12   :  { %162 = vperm.xlu0 %816, %v33_v9  }
  0x14   :  { %818 = vset.pattern.permute.xlu1 %v927_v7 }
  0x15   :  { %12 = vsyncpa [#allocation3], 0  ;;  %333 = vperm.xlu1 %818, %v259_v10   ;;  %v1012_v12 = vld [vmem:[%s1250_s1] sm:$0xff]  ;;  %v40_v13 = vld [vmem:[%s1250_s1 + $0x58] sm:$0xff]  ;;  %v125_v54 = vlaneseq  ;;  %vm929_vm0 = vmmov 0   ;;  %s930_s18 = smov [#allocation2]  }
  0x16   :  { %154 = vperm.xlu0 %816, %v1005_v11   ;;  %v257_v14 = vld [vmem:[%s1251_s2 + $0x60] sm:$0xff]  ;;  %v260_v15 = vld [vmem:[%s1251_s2 + $0x78] sm:$0xff]  ;;  %v38_v16 = vld [vmem:[%s1250_s1 + $0x48] sm:$0xff]  ;;  %s716_s19 = sshll.u32 %s930_s18, 4  ;;  %s717_s19 = int_to_ptr.vmem [resolvable:$true] %s716_s19 }
  0x17   :  { %v258_v17 = vld [vmem:[%s1251_s2 + $0x68] sm:$0xff]  ;;  %v256_v18 = vld [vmem:[%s1251_s2 + $0x58] sm:$0xff]  ;;  %v255_v20 = vld [vmem:[%s1251_s2 + $0x50] sm:$0xff]  ;;  %v126_v58 = vshrl.u32 %v125_v54, 7  ;;  %s904_s20 = scalar_lea.vmem %s717_s19, 32  ;;  %p909_p1 = scmp.lt.s32.totalorder %s717_s19, %s717_s19 }
  0x18   :  { %v254_v19 = vld [vmem:[%s1251_s2 + $0x48] sm:$0xff]  ;;  %v252_v21 = vld [vmem:[%s1251_s2 + $0x38] sm:$0xff]  ;;  %v411_v25 = vld [vmem:[%s1253_s4 + $0x70] sm:$0xff]  ;;  %p905_p0 = scmp.ne.s32.totalorder %s717_s19, %s904_s20  ;;  %p910_p2 = scmp.lt.s32.totalorder %s904_s20, %s904_s20 }
  0x19   :  { %97 = vperm.xlu1 %818, %v39_v4   ;;  %v250_v22 = vld [vmem:[%s1251_s2 + $0x28] sm:$0xff]  ;;  %v36_v23 = vld [vmem:[%s1250_s1 + $0x38] sm:$0xff]  ;;  %v253_v26 = vld [vmem:[%s1251_s2 + $0x40] sm:$0xff]  ;;  %v211_v62 = vsub.s32 1, %v126_v58  ;;  %v127_v63 = vsub.s32 0, %v126_v58 }
  0x1a   :  { %146 = vperm.xlu0 %816, %v1012_v12   ;;  %v248_v24 = vld [vmem:[%s1251_s2 + $0x18] sm:$0xff]  ;;  %v409_v27 = vld [vmem:[%s1253_s4 + $0x60] sm:$0xff]  ;;  %v407_v28 = vld [vmem:[%s1253_s4 + $0x50] sm:$0xff]  ;;  %p911_p3 = por %p910_p2, %p909_p1 }
  0x1b   :  { %v34_v29 = vld [vmem:[%s1250_s1 + $0x28] sm:$0xff]  ;;  %v405_v30 = vld [vmem:[%s1253_s4 + $0x40] sm:$0xff]  ;;  %v403_v31 = vld [vmem:[%s1253_s4 + $0x30] sm:$0xff] }
  0x1c   :  { %v401_v32 = vld [vmem:[%s1253_s4 + $0x20] sm:$0xff]  ;;  %v251_v33 = vld [vmem:[%s1251_s2 + $0x30] sm:$0xff]  ;;  %v32_v36 = vld [vmem:[%s1250_s1 + $0x18] sm:$0xff]  ;;  %p912_p4 = pnand %p911_p3, %p905_p0 }
  0x1d   :  { %102 = vperm.xlu1 %818, %v40_v13   ;;  %v399_v34 = vld [vmem:[%s1253_s4 + $0x10] sm:$0xff]  ;;  %v397_v35 = vld [vmem:[%s1253_s4] sm:$0xff]  ;;  %v30_v39 = vld [vmem:[%s1250_s1 + $0x8] sm:$0xff] }
  0x1e   :  { %829 = vset.pattern.permute.xlu0 %v927_v7  ;;  %v663_v37 = vld [vmem:[%s1255_s6] sm:$0x3]  ;;  %v247_v42 = vld [vmem:[%s1251_s2 + $0x10] sm:$0xff]  ;;  %v246_v48 = vld [vmem:[%s1251_s2 + $0x8] sm:$0xff] }
  0x1f   :  { %117 = vperm.xlu0 %829, %v43_v0   ;;  %v249_v38 = vld [vmem:[%s1251_s2 + $0x20] sm:$0xff]  ;;  %v412_v50 = vld [vmem:[%s1253_s4 + $0x78] sm:$0xff]  ;;  %v410_v53 = vld [vmem:[%s1253_s4 + $0x68] sm:$0xff] }
  0x20   :  { %v245_v45 = vld [vmem:[%s1251_s2] sm:$0xff]  ;;  %v408_v57 = vld [vmem:[%s1253_s4 + $0x58] sm:$0xff]  ;;  %v406_v61 = vld [vmem:[%s1253_s4 + $0x48] sm:$0xff] }
  0x21   :  { %819 = vset.pattern.permute.xlu1 %v926_v2  ;;  %v28_v0 = vld [vmem:[%s1249_s0] sm:$0x3]  ;;  %v404_v4 = vld [vmem:[%s1253_s4 + $0x38] sm:$0xff]  ;;  %v402_v10 = vld [vmem:[%s1253_s4 + $0x28] sm:$0xff] }
  0x22   :  { %190 = vperm.xlu1 %819, %v40_v13   ;;  %v1155_v6 = vrot.slane %v28_v0, %v127_v63 }
  0x23   :  { %122 = vperm.xlu0 %829, %v44_v3  }
  0x26   :  { %820 = vset.pattern.permute.xlu1 %v927_v7 }
  0x27   :  { %323 = vperm.xlu1 %820, %v257_v14   ;;  %107 = vperm.xlu0 %829, %v41_v1  }
  0x2b   :  { %87 = vperm.xlu1 %820, %v37_v5   ;;  %338 = vperm.xlu0 %829, %v260_v15   ;;  %v1153_v5 = vrot.slane %v28_v0, %v211_v62 }
  0x2f   :  { %92 = vperm.xlu1 %820, %v38_v16   ;;  %328 = vperm.xlu0 %829, %v258_v17   ;;  %v400_v17 = vld [vmem:[%s1253_s4 + $0x18] sm:$0xff] }
  0x33   :  { %821 = vset.pattern.permute.xlu1 %v926_v2  ;;  %318 = vperm.xlu0 %829, %v256_v18  }
  0x34   :  { %182 = vperm.xlu1 %821, %v38_v16  }
  0x37   :  { %308 = vperm.xlu0 %829, %v254_v19  }
  0x38   :  { %822 = vset.pattern.permute.xlu1 %v927_v7 }
  0x39   :  { %313 = vperm.xlu1 %822, %v255_v20  }
  0x3b   :  { %298 = vperm.xlu0 %829, %v252_v21  }
  0x3d   :  { %77 = vperm.xlu1 %822, %v35_v8  }
  0x3f   :  { %288 = vperm.xlu0 %829, %v250_v22  }
  0x41   :  { %82 = vperm.xlu1 %822, %v36_v23  }
  0x43   :  { %278 = vperm.xlu0 %829, %v248_v24  }
  0x45   :  { %823 = vset.pattern.permute.xlu1 %v926_v2 }
  0x46   :  { %174 = vperm.xlu1 %823, %v36_v23  }
  0x47   :  { %485 = vperm.xlu0 %829, %v411_v25  }
  0x4a   :  { %824 = vset.pattern.permute.xlu1 %v927_v7 }
  0x4b   :  { %303 = vperm.xlu1 %824, %v253_v26   ;;  %475 = vperm.xlu0 %829, %v409_v27   ;;  %v398_v26 = vld [vmem:[%s1253_s4 + $0x8] sm:$0xff] }
  0x4f   :  { %67 = vperm.xlu1 %824, %v33_v9   ;;  %465 = vperm.xlu0 %829, %v407_v28  }
  0x53   :  { %72 = vperm.xlu1 %824, %v34_v29   ;;  %455 = vperm.xlu0 %829, %v405_v30  }
  0x57   :  { %825 = vset.pattern.permute.xlu1 %v926_v2  ;;  %445 = vperm.xlu0 %829, %v403_v31  }
  0x58   :  { %166 = vperm.xlu1 %825, %v34_v29  }
  0x5b   :  { %435 = vperm.xlu0 %829, %v401_v32  }
  0x5c   :  { %826 = vset.pattern.permute.xlu1 %v927_v7 }
  0x5d   :  { %293 = vperm.xlu1 %826, %v251_v33  }
  0x5f   :  { %425 = vperm.xlu0 %829, %v399_v34  }
  0x61   :  { %57 = vperm.xlu1 %826, %v1005_v11  }
  0x63   :  { %415 = vperm.xlu0 %829, %v397_v35  }
  0x65   :  { %62 = vperm.xlu1 %826, %v32_v36  }
  0x67   :  { %666 = vperm.xlu0 %829, %v663_v37  }
  0x69   :  { %827 = vset.pattern.permute.xlu1 %v926_v2 }
  0x6a   :  { %158 = vperm.xlu1 %827, %v32_v36  }
  0x6e   :  { %828 = vset.pattern.permute.xlu1 %v927_v7 }
  0x6f   :  { %283 = vperm.xlu1 %828, %v249_v38  }
  0x73   :  { %47 = vperm.xlu1 %828, %v1012_v12  }
  0x77   :  { %52 = vperm.xlu1 %828, %v30_v39  }
  0x7b   :  { %830 = vset.pattern.permute.xlu1 %v926_v2  ;;  %v832_v2 = vld [vmem:[%s1252_s3] sm:$0xff]  }
  0x7c   :  { %150 = vperm.xlu1 %830, %v30_v39   ;;  %773 = vmatprep.mubr.bf16.mxu0 %v832_v2 }
  0x7d   :  { %v203_v40 = vpop.permute.xlu1 %202  ;;  %v195_v41 = vpop.permute.xlu0 %194 }
  0x7e   :  { %v227_v11 = vmul.f32 %v1153_v5, %v203_v40  ;;  %v225_v12 = vmul.f32 %v1153_v5, %v195_v41 }
  0x80   :  { %831 = vset.pattern.permute.xlu1 %v927_v7 }
  0x81   :  { %v207_v43 = vpop.permute.xlu1 %206  ;;  %273 = vperm.xlu1 %831, %v247_v42   ;;  %v1114_v44 = vpop.permute.xlu0 %186 }
  0x82   :  { %v228_v18 = vmul.f32 %v1153_v5, %v207_v43  ;;  %v223_v36 = vmul.f32 %v1153_v5, %v1114_v44 }
  0x85   :  { %263 = vperm.xlu1 %831, %v245_v45   ;;  %v1119_v46 = vpop.permute.xlu0 %178 }
  0x86   :  { %v113_v47 = vpop.permute.xlu1 %112 }
  0x87   :  { %v142_v27 = vmul.f32 %v1155_v6, %v113_v47 }
  0x89   :  { %268 = vperm.xlu1 %831, %v246_v48   ;;  %v1124_v49 = vpop.permute.xlu0 %170 }
  0x8b   :  { %v199_v51 = vpop.permute.xlu1 %198 }
  0x8c   :  { %v226_v20 = vmul.f32 %v1153_v5, %v199_v51 }
  0x8d   :  { %490 = vperm.xlu1 %831, %v412_v50   ;;  %v1129_v52 = vpop.permute.xlu0 %162 }
  0x8e   :  { %v242_v30 = vadd.f32 %v226_v20, %v142_v27 }
  0x90   :  { %v334_v55 = vpop.permute.xlu1 %333 }
  0x91   :  { %480 = vperm.xlu1 %831, %v410_v53   ;;  %v1134_v56 = vpop.permute.xlu0 %154 }
  0x94   :  { %v98_v59 = vpop.permute.xlu1 %97 }
  0x95   :  { %470 = vperm.xlu1 %831, %v408_v57   ;;  %v1139_v60 = vpop.permute.xlu0 %146  ;;  %v139_v37 = vmul.f32 %v1155_v6, %v98_v59 }
  0x97   :  { %v239_v42 = vadd.f32 %v223_v36, %v139_v37 }
  0x98   :  { %v103_v1 = vpop.permute.xlu1 %102 }
  0x99   :  { %460 = vperm.xlu1 %831, %v406_v61   ;;  %v140_v35 = vmul.f32 %v1155_v6, %v103_v1  ;;  %v221_v61 = vmul.f32 %v1153_v5, %v1119_v46 }
  0x9a   :  { %v118_v3 = vpop.permute.xlu0 %117 }
  0x9b   :  { %v143_v7 = vmul.f32 %v1155_v6, %v118_v3 }
  0x9d   :  { %v191_v8 = vpop.permute.xlu1 %190  ;;  %450 = vperm.xlu1 %831, %v404_v4   ;;  %v243_v13 = vadd.f32 %v227_v11, %v143_v7 }
  0x9e   :  { %v123_v9 = vpop.permute.xlu0 %122  ;;  %v224_v34 = vmul.f32 %v1153_v5, %v191_v8 }
  0x9f   :  { %v144_v14 = vmul.f32 %v1155_v6, %v123_v9  ;;  %v355_v21 = vadd.f32 %v334_v55, %v243_v13 }
  0xa0   :  { %v240_v40 = vadd.f32 %v224_v34, %v140_v35 }
  0xa1   :  { %440 = vperm.xlu1 %831, %v402_v10   ;;  %v244_v23 = vadd.f32 %v228_v18, %v144_v14  ;;  %840 = vtanh.f32 %v355_v21  ;;  %v219_v14 = vmul.f32 %v1153_v5, %v1124_v49 }
  0xa2   :  { %v324_v15 = vpop.permute.xlu1 %323  ;;  %v108_v16 = vpop.permute.xlu0 %107 }
  0xa3   :  { %v141_v19 = vmul.f32 %v1155_v6, %v108_v16 }
  0xa5   :  { %v241_v22 = vadd.f32 %v225_v12, %v141_v19  ;;  %430 = vperm.xlu1 %831, %v400_v17  }
  0xa6   :  { %v88_v24 = vpop.permute.xlu1 %87  ;;  %v339_v25 = vpop.permute.xlu0 %338 }
  0xa7   :  { %v356_v28 = vadd.f32 %v339_v25, %v244_v23  ;;  %v353_v29 = vadd.f32 %v324_v15, %v241_v22  ;;  %v137_v62 = vmul.f32 %v1155_v6, %v88_v24 }
  0xa9   :  { %420 = vperm.xlu1 %831, %v398_v26   ;;  %842 = vtanh.f32 %v356_v28  ;;  %v237_v4 = vadd.f32 %v221_v61, %v137_v62  ;;  %v213_v61 = vmul.f32 %v1153_v5, %v1139_v60 }
  0xaa   :  { %v93_v31 = vpop.permute.xlu1 %92  ;;  %v329_v32 = vpop.permute.xlu0 %328  ;;  %844 = vtanh.f32 %v353_v29 }
  0xab   :  { %v354_v33 = vadd.f32 %v329_v32, %v242_v30  ;;  %v138_v58 = vmul.f32 %v1155_v6, %v93_v31  ;;  %v217_v32 = vmul.f32 %v1153_v5, %v1129_v52 }
  0xad   :  { %846 = vtanh.f32 %v354_v33 }
  0xae   :  { %v319_v38 = vpop.permute.xlu0 %318  ;;  %v841_v47 = vpop.eup %840 }
  0xaf   :  { %v183_v39 = vpop.permute.xlu1 %182  ;;  %v352_v41 = vadd.f32 %v319_v38, %v240_v40 }
  0xb0   :  { %v222_v55 = vmul.f32 %v1153_v5, %v183_v39 }
  0xb1   :  { %848 = vtanh.f32 %v352_v41 }
  0xb2   :  { %v238_v59 = vadd.f32 %v222_v55, %v138_v58  ;;  %v309_v63 = vpop.permute.xlu0 %308 }
  0xb4   :  { %v314_v43 = vpop.permute.xlu1 %313  ;;  %v350_v3 = vadd.f32 %v309_v63, %v238_v59 }
  0xb5   :  { %v351_v45 = vadd.f32 %v314_v43, %v239_v42 }
  0xb6   :  { %v843_v48 = vpop.eup %842  ;;  %v299_v18 = vpop.permute.xlu0 %298 }
  0xb7   :  { %850 = vtanh.f32 %v351_v45  ;;  %v380_v51 = vpack.c.bf16 %v843_v48, %v841_v47  ;;  %v845_v53 = vpop.eup %844 }
  0xb8   :  { %v78_v50 = vpop.permute.xlu1 %77  ;;  %852 = vtanh.f32 %v350_v3 }
  0xb9   :  { %757 = vmatprep.subr.bf16.mxu0 %v380_v51  ;;  %v135_v15 = vmul.f32 %v1155_v6, %v78_v50  ;;  %v215_v50 = vmul.f32 %v1153_v5, %v1134_v56 }
  0xba   :  { %v847_v54 = vpop.eup %846  ;;  %758 = vmatpush3.bf16.msra.mxu0 %v380_v51  ;;  %v289_v33 = vpop.permute.xlu0 %288 }
  0xbb   :  { %v379_v44 = vpack.c.bf16 %v847_v54, %v845_v53  ;;  %v235_v21 = vadd.f32 %v219_v14, %v135_v15  ;;  %v838_v14 = vld [vmem:[%s1252_s3 + $0x30] sm:$0xff]   ;;  %v839_v15 = vld [vmem:[%s1252_s3 + $0x38] sm:$0xff]  }
  0xbc   :  { %v83_v57 = vpop.permute.xlu1 %82 }
  0xbd   :  { %759 = vmatprep.subr.bf16.mxu0 %v379_v44  ;;  %v136_v46 = vmul.f32 %v1155_v6, %v83_v57 }
  0xbe   :  { %760 = vmatpush3.bf16.msra.mxu0 %v379_v44  ;;  %v849_v1 = vpop.eup %848  ;;  %v279_v51 = vpop.permute.xlu0 %278 }
  0xc1   :  { %v175_v0 = vpop.permute.xlu1 %174 }
  0xc2   :  { %v220_v11 = vmul.f32 %v1153_v5, %v175_v0 }
  0xc4   :  { %v851_v2 = vpop.eup %850  ;;  %v236_v13 = vadd.f32 %v220_v11, %v136_v46  ;;  %v836_v46 = vld [vmem:[%s1252_s3 + $0x20] sm:$0xff]  }
  0xc5   :  { %v378_v7 = vpack.c.bf16 %v849_v1, %v851_v2  ;;  %v853_v17 = vpop.eup %852 }
  0xc6   :  { %v304_v8 = vpop.permute.xlu1 %303  ;;  %v348_v20 = vadd.f32 %v299_v18, %v236_v13  ;;  %v837_v13 = vld [vmem:[%s1252_s3 + $0x28] sm:$0xff]  }
  0xc7   :  { %v349_v9 = vadd.f32 %v304_v8, %v237_v4  ;;  %761 = vmatprep.subr.bf16.mxu0 %v378_v7 }
  0xc8   :  { %762 = vmatpush3.bf16.msra.mxu0 %v378_v7 }
  0xc9   :  { %854 = vtanh.f32 %v349_v9 }
  0xca   :  { %v68_v10 = vpop.permute.xlu1 %67  ;;  %856 = vtanh.f32 %v348_v20 }
  0xcb   :  { %v133_v29 = vmul.f32 %v1155_v6, %v68_v10 }
  0xcd   :  { %v233_v36 = vadd.f32 %v217_v32, %v133_v29 }
  0xce   :  { %v73_v12 = vpop.permute.xlu1 %72 }
  0xcf   :  { %v134_v49 = vmul.f32 %v1155_v6, %v73_v12  ;;  %v835_v12 = vld [vmem:[%s1252_s3 + $0x18] sm:$0xff]  }
  0xd3   :  { %v167_v16 = vpop.permute.xlu1 %166 }
  0xd4   :  { %v218_v26 = vmul.f32 %v1153_v5, %v167_v16  ;;  %v928_v16 = vmov 0.0  }
  0xd5   :  { %789 = vmatprep.subr.bf16.mxu1 %v928_v16  ;;  %805 = vmatprep.mubr.msk.bf16.mxu1 %vm929_vm0, %v928_v16 }
  0xd6   :  { %v855_v19 = vpop.eup %854  ;;  %v234_v28 = vadd.f32 %v218_v26, %v134_v49 }
  0xd7   :  { %v377_v22 = vpack.c.bf16 %v853_v17, %v855_v19  ;;  %v857_v31 = vpop.eup %856 }
  0xd8   :  { %v294_v23 = vpop.permute.xlu1 %293  ;;  %v346_v35 = vadd.f32 %v289_v33, %v234_v28 }
  0xd9   :  { %v347_v24 = vadd.f32 %v294_v23, %v235_v21  ;;  %763 = vmatprep.subr.bf16.mxu0 %v377_v22 }
  0xda   :  { %764 = vmatpush3.bf16.msra.mxu0 %v377_v22 }
  0xdb   :  { %858 = vtanh.f32 %v347_v24  ;;  %v486_v24 = vpop.permute.xlu0 %485 }
  0xdc   :  { %v58_v25 = vpop.permute.xlu1 %57  ;;  %860 = vtanh.f32 %v346_v35 }
  0xdd   :  { %v131_v52 = vmul.f32 %v1155_v6, %v58_v25 }
  0xdf   :  { %v231_v44 = vadd.f32 %v215_v50, %v131_v52  ;;  %v476_v28 = vpop.permute.xlu0 %475 }
  0xe0   :  { %v63_v27 = vpop.permute.xlu1 %62 }
  0xe1   :  { %v132_v43 = vmul.f32 %v1155_v6, %v63_v27 }
  0xe3   :  { %v466_v33 = vpop.permute.xlu0 %465 }
  0xe5   :  { %v159_v30 = vpop.permute.xlu1 %158 }
  0xe6   :  { %v216_v41 = vmul.f32 %v1153_v5, %v159_v30 }
  0xe8   :  { %v859_v34 = vpop.eup %858  ;;  %v232_v45 = vadd.f32 %v216_v41, %v132_v43 }
  0xe9   :  { %v376_v37 = vpack.c.bf16 %v857_v31, %v859_v34  ;;  %v861_v48 = vpop.eup %860 }
  0xea   :  { %v284_v38 = vpop.permute.xlu1 %283  ;;  %v344_v54 = vadd.f32 %v279_v51, %v232_v45 }
  0xeb   :  { %v345_v39 = vadd.f32 %v284_v38, %v233_v36  ;;  %765 = vmatprep.subr.bf16.mxu0 %v376_v37 }
  0xec   :  { %766 = vmatpush3.bf16.msra.mxu0 %v376_v37 }
  0xed   :  { %862 = vtanh.f32 %v345_v39 }
  0xee   :  { %v48_v40 = vpop.permute.xlu1 %47  ;;  %864 = vtanh.f32 %v344_v54 }
  0xef   :  { %v129_v57 = vmul.f32 %v1155_v6, %v48_v40  ;;  %v456_v40 = vpop.permute.xlu0 %455 }
  0xf1   :  { %v229_v56 = vadd.f32 %v213_v61, %v129_v57 }
  0xf2   :  { %v53_v42 = vpop.permute.xlu1 %52 }
  0xf3   :  { %v130_v0 = vmul.f32 %v1155_v6, %v53_v42  ;;  %v834_v6 = vld [vmem:[%s1252_s3 + $0x10] sm:$0xff]  }
  0xf7   :  { %v151_v47 = vpop.permute.xlu1 %150 }
  0xf8   :  { %v214_v62 = vmul.f32 %v1153_v5, %v151_v47  ;;  %v833_v5 = vld [vmem:[%s1252_s3 + $0x8] sm:$0xff]  }
  0xfa   :  { %v863_v53 = vpop.eup %862  ;;  %v230_v2 = vadd.f32 %v214_v62, %v130_v0 }
  0xfb   :  { %v375_v55 = vpack.c.bf16 %v861_v48, %v863_v53  ;;  %v865_v7 = vpop.eup %864  ;;  %v446_v48 = vpop.permute.xlu0 %445 }
  0xfc   :  { %v274_v58 = vpop.permute.xlu1 %273 }
  0xfd   :  { %v343_v59 = vadd.f32 %v274_v58, %v231_v44  ;;  %767 = vmatprep.subr.bf16.mxu0 %v375_v55 }
  0xfe   :  { %768 = vmatpush3.bf16.msra.mxu0 %v375_v55 }
  0xff   :  { %866 = vtanh.f32 %v343_v59  ;;  %v436_v44 = vpop.permute.xlu0 %435 }
 0x100   :  { %v264_v63 = vpop.permute.xlu1 %263 }
 0x101   :  { %v341_v1 = vadd.f32 %v264_v63, %v229_v56 }
 0x103   :  { %868 = vtanh.f32 %v341_v1  ;;  %v426_v1 = vpop.permute.xlu0 %425 }
 0x104   :  { %v269_v3 = vpop.permute.xlu1 %268 }
 0x105   :  { %v342_v4 = vadd.f32 %v269_v3, %v230_v2 }
 0x107   :  { %870 = vtanh.f32 %v342_v4 }
 0x108   :  { %v491_v22 = vpop.permute.xlu1 %490 }
 0x10c   :  { %v867_v8 = vpop.eup %866  ;;  %v481_v27 = vpop.permute.xlu1 %480 }
 0x10d   :  { %v374_v9 = vpack.c.bf16 %v865_v7, %v867_v8 }
 0x10f   :  { %769 = vmatprep.subr.bf16.mxu0 %v374_v9 }
 0x110   :  { %770 = vmatpush3.bf16.msra.mxu0 %v374_v9  ;;  %v869_v60 = vpop.eup %868  ;;  %v471_v31 = vpop.permute.xlu1 %470 }
 0x114   :  { %v871_v10 = vpop.eup %870  ;;  %v461_v37 = vpop.permute.xlu1 %460 }
 0x115   :  { %v373_v11 = vpack.c.bf16 %v871_v10, %v869_v60 }
 0x117   :  { %771 = vmatprep.subr.bf16.mxu0 %v373_v11 }
 0x118   :  { %772 = vmatpush3.bf16.msra.mxu0 %v373_v11  ;;  %v451_v52 = vpop.permute.xlu1 %450 }
 0x11b   :  { %774 = vmatmul.mubr.bf16.vlgmr.msra.gmra.mxu0 %v833_v5  ;;  %v416_v5 = vpop.permute.xlu0 %415 }
 0x11c   :  { %777 = vmatprep.mubr.bf16.mxu0 %v834_v6  ;;  %v441_v53 = vpop.permute.xlu1 %440 }
 0x120   :  { %v431_v63 = vpop.permute.xlu1 %430 }
 0x123   :  { %778 = vmatmul.mubr.bf16.gmra.mxu0 %v835_v12 }
 0x124   :  { %781 = vmatprep.mubr.bf16.mxu0 %v836_v46  ;;  %v421_v9 = vpop.permute.xlu1 %420 }
 0x12b   :  { %782 = vmatmul.mubr.bf16.gmra.mxu0 %v837_v13 }
 0x12c   :  { %785 = vmatprep.mubr.bf16.mxu0 %v838_v14 }
 0x133   :  { %786 = vmatmul.mubr.bf16.gmra.mxu0 %v839_v15 }
 0x1db   :  { %v1227_v17 = vpop.f32.mrf.mxu0 }
 0x1dc   :  { %v584_v7 = vadd.f32 %v1227_v17, %v426_v1 }
 0x1dd   :  { %v1229_v18 = vpop.f32.mrf.mxu0 }
 0x1de   :  { %v576_v6 = vadd.f32 %v1229_v18, %v416_v5 }
 0x1df   :  { %v776_v19 = vpop.f32.mrf.mxu0 }
 0x1e0   :  { %v587_v2 = vadd.f32 %v776_v19, %v431_v63 }
 0x1e1   :  { %v1231_v20 = vpop.f32.mrf.mxu0 }
 0x1e2   :  { %v579_v60 = vadd.f32 %v1231_v20, %v421_v9 }
 0x1e3   :  { %v779_v21 = vpop.f32.mrf.mxu0 }
 0x1e4   :  { %v600_v57 = vadd.f32 %v779_v21, %v446_v48 }
 0x1e5   :  { %v591_v23 = vpop.f32.mrf.mxu0 }
 0x1e6   :  { %v592_v56 = vadd.f32 %v591_v23, %v436_v44 }
 0x1e7   :  { %v780_v25 = vpop.f32.mrf.mxu0 }
 0x1e8   :  { %v603_v54 = vadd.f32 %v780_v25, %v451_v52 }
 0x1e9   :  { %v594_v26 = vpop.f32.mrf.mxu0 }
 0x1ea   :  { %v595_v59 = vadd.f32 %v594_v26, %v441_v53  ;;  %v662_v26 = vld [vmem:[%s1254_s5] sm:$0x1] }
 0x1eb   :  { %v783_v49 = vpop.f32.mrf.mxu0 }
 0x1ec   :  { %v616_v47 = vadd.f32 %v783_v49, %v466_v33 }
 0x1ed   :  { %v607_v29 = vpop.f32.mrf.mxu0 }
 0x1ee   :  { %v608_v51 = vadd.f32 %v607_v29, %v456_v40 }
 0x1ef   :  { %v784_v30 = vpop.f32.mrf.mxu0 }
 0x1f0   :  { %v619_v45 = vadd.f32 %v784_v30, %v471_v31 }
 0x1f1   :  { %v610_v32 = vpop.f32.mrf.mxu0 }
 0x1f2   :  { %v611_v50 = vadd.f32 %v610_v32, %v461_v37 }
 0x1f3   :  { %v787_v34 = vpop.f32.mrf.mxu0 }
 0x1f4   :  { %v632_v35 = vadd.f32 %v787_v34, %v486_v24 }
 0x1f5   :  { %v623_v36 = vpop.f32.mrf.mxu0 }
 0x1f6   :  { %872 = vtanh.f32 %v632_v35  ;;  %v624_v42 = vadd.f32 %v623_v36, %v476_v28 }
 0x1f7   :  { %v788_v38 = vpop.f32.mrf.mxu0 }
 0x1f8   :  { %v635_v39 = vadd.f32 %v788_v38, %v491_v22 }
 0x1f9   :  { %v626_v41 = vpop.f32.mrf.mxu0 }
 0x1fa   :  { %874 = vtanh.f32 %v635_v39  ;;  %v627_v43 = vadd.f32 %v626_v41, %v481_v27  ;;  %v667_v27 = vpop.permute.xlu0 %666 }
 0x1fc   :  { %876 = vtanh.f32 %v627_v43 }
 0x1fd   :  { %878 = vtanh.f32 %v624_v42 }
 0x1fe   :  { %880 = vtanh.f32 %v619_v45 }
 0x1ff   :  { %882 = vtanh.f32 %v616_v47 }
 0x200   :  { %884 = vtanh.f32 %v611_v50 }
 0x201   :  { %886 = vtanh.f32 %v608_v51 }
 0x202   :  { %888 = vtanh.f32 %v603_v54 }
 0x203   :  { %v873_v55 = vpop.eup %872  ;;  %890 = vtanh.f32 %v600_v57 }
 0x204   :  { %892 = vtanh.f32 %v595_v59 }
 0x205   :  { %894 = vtanh.f32 %v592_v56 }
 0x206   :  { %896 = vtanh.f32 %v587_v2 }
 0x207   :  { %v875_v58 = vpop.eup %874  ;;  %898 = vtanh.f32 %v584_v7 }
 0x208   :  { %v661_v61 = vpack.c.bf16 %v875_v58, %v873_v55  ;;  %900 = vtanh.f32 %v579_v60 }
 0x209   :  { %v877_v62 = vpop.eup %876  ;;  %902 = vtanh.f32 %v576_v6 }
 0x20a   :  { %790 = vmatpush3.bf16.msra.mxu1 %v661_v61  ;;  %v879_v0 = vpop.eup %878 }
 0x20b   :  { %791 = vmatprep.subr.bf16.mxu1 %v928_v16  ;;  %v660_v3 = vpack.c.bf16 %v877_v62, %v879_v0  ;;  %v881_v4 = vpop.eup %880 }
 0x20c   :  { %v883_v8 = vpop.eup %882 }
 0x20d   :  { %v659_v10 = vpack.c.bf16 %v881_v4, %v883_v8  ;;  %v885_v11 = vpop.eup %884 }
 0x20e   :  { %792 = vmatpush3.bf16.msra.mxu1 %v660_v3  ;;  %v887_v12 = vpop.eup %886 }
 0x20f   :  { %793 = vmatprep.subr.bf16.mxu1 %v928_v16  ;;  %v658_v46 = vpack.c.bf16 %v885_v11, %v887_v12  ;;  %v889_v13 = vpop.eup %888 }
 0x210   :  { %v891_v14 = vpop.eup %890 }
 0x211   :  { %v657_v15 = vpack.c.bf16 %v889_v13, %v891_v14  ;;  %v893_v17 = vpop.eup %892 }
 0x212   :  { %794 = vmatpush3.bf16.msra.mxu1 %v659_v10  ;;  %v895_v19 = vpop.eup %894 }
 0x213   :  { %795 = vmatprep.subr.bf16.mxu1 %v928_v16  ;;  %v656_v20 = vpack.c.bf16 %v893_v17, %v895_v19  ;;  %v897_v18 = vpop.eup %896 }
 0x214   :  { %v899_v21 = vpop.eup %898 }
 0x215   :  { %v655_v22 = vpack.c.bf16 %v897_v18, %v899_v21  ;;  %v901_v23 = vpop.eup %900 }
 0x216   :  { %796 = vmatpush3.bf16.msra.mxu1 %v658_v46  ;;  %v903_v24 = vpop.eup %902 }
 0x217   :  { %797 = vmatprep.subr.bf16.mxu1 %v928_v16  ;;  %v654_v25 = vpack.c.bf16 %v901_v23, %v903_v24 }
 0x21a   :  { %798 = vmatpush3.bf16.msra.mxu1 %v657_v15 }
 0x21b   :  { %799 = vmatprep.subr.bf16.mxu1 %v928_v16 }
 0x21e   :  { %800 = vmatpush3.bf16.msra.mxu1 %v656_v20 }
 0x21f   :  { %801 = vmatprep.subr.bf16.mxu1 %v928_v16 }
 0x222   :  { %802 = vmatpush3.bf16.msra.mxu1 %v655_v22 }
 0x223   :  { %803 = vmatprep.subr.bf16.mxu1 %v928_v16 }
 0x226   :  { %804 = vmatpush3.bf16.msra.mxu1 %v654_v25 }
 0x229   :  { %806 = vmatmul.mubr.bf16.vlgmr.msra.gmra.mxu1 %v662_v26 }
 0x2e9   :  { %v703_v49 = vpop.f32.mrf.mxu1 }
 0x2ea   :  { %v704_v28 = vadd.f32 %v703_v49, %v667_v27 }
 0x2eb   :  { %v807_v29 = vpop.f32.mrf.mxu1 }
 0x2ec   :  { %709 = vst [vmem:[#allocation2] sm:$0x3] %v704_v28 }
 0x2ed   :  { %v706_v30 = vpop.f32.mrf.mxu1 }
 0x2ee   :  { %915 = shalt.err (!%p912_p4)
}
 0x2ef   :  { %719 = dma.vmem_to_hbm [thread:$0]  %s717_s19, 32, %s1256_s7, [#allocation3]   ;;  %v808_v16 = vpop.f32.mrf.mxu1 }
 0x2f0   :  { %924 = dma.done.wait [#allocation3], 32  }
 0x2f1   :  { %925 = vsyncadd [#allocation3], 4294967264 }
 0x2f2   :  { %723 = vsyncpa [#allocation3], 1 }

</bundles_post_ra>
